<compile_context>
chip_gen: v7x
topology: tpu7x:2x2x1
jax: 0.10.0
libtpu: 0.0.40
codegen_flags: <defaults>
</compile_context>

<pallas_src>
import math
import numpy as np
import jax
import jax.numpy as jnp
from jax import lax
from jax.experimental import pallas as pl
from jax.experimental.pallas import tpu as pltpu


# ---------------------------------------------------------------------------
# Host-side glue: farthest point sampling + radius neighbor search.
# TODO(synk): FPS and radius search are variable-length, data-dependent index
# selections with no clean Pallas mapping; kept on host (numpy).
# ---------------------------------------------------------------------------
def fps_numpy(pos, batch, ratio):
    idx_all = []
    for b in np.unique(batch):
        orig = np.nonzero(batch == b)[0]
        pts = pos[orig]
        n = pts.shape[0]
        m = int(math.ceil(ratio * n))
        sel = [0]
        d = np.linalg.norm(pts - pts[0], axis=1)
        for _ in range(m - 1):
            nxt = int(np.argmax(d))
            sel.append(nxt)
            d = np.minimum(d, np.linalg.norm(pts - pts[nxt], axis=1))
        idx_all.append(orig[np.array(sel, dtype=np.int64)])
    return np.concatenate(idx_all)


def radius_numpy(pos, centers, r, batch, batch_centers, max_k):
    M = centers.shape[0]
    d = np.linalg.norm(centers[:, None, :] - pos[None, :, :], axis=-1)
    valid = (d <= r) & (batch_centers[:, None] == batch[None, :])
    nbr_idx = np.zeros((M, max_k), dtype=np.int32)
    counts = np.zeros((M,), dtype=np.int32)
    for m in range(M):
        js = np.nonzero(valid[m])[0][:max_k]
        nbr_idx[m, : js.shape[0]] = js
        counts[m] = js.shape[0]
    return nbr_idx, counts


# ---------------------------------------------------------------------------
# Pallas kernel: per-edge MLP (Lin+ReLU, Lin+ReLU, Lin) on cat([x_j, p_j-p_i]),
# applied as h = W^T @ f with the center axis on lanes, followed by a running
# masked max over the K neighbor slots (leading axis -> pure VPU work).
# ---------------------------------------------------------------------------
def pointconv_kernel(feats_ref, counts_ref, w1_ref, b1_ref, w2_ref, b2_ref,
                     w3_ref, b3_ref, out_ref):
    K = feats_ref.shape[0]
    OUT, tm = out_ref.shape

    # Hoist weight/bias loads out of the K loop.
    w1 = w1_ref[...]; b1 = b1_ref[...]
    w2 = w2_ref[...]; b2 = b2_ref[...]
    w3 = w3_ref[...]; b3 = b3_ref[...]
    counts = counts_ref[...]                              # [1, tm] int32

    def body(k, acc):
        f = feats_ref[k]                                  # [D, tm]  (lanes = centers)
        h = jnp.maximum(jnp.dot(w1, f, preferred_element_type=jnp.float32) + b1, 0.0)
        h = jnp.maximum(jnp.dot(w2, h, preferred_element_type=jnp.float32) + b2, 0.0)
        h = jnp.dot(w3, h, preferred_element_type=jnp.float32) + b3   # [OUT, tm]
        valid = counts > k                                # [1, tm] -> broadcast over OUT
        return jnp.maximum(acc, jnp.where(valid, h, jnp.float32(-1e30)))

    out_ref[...] = lax.fori_loop(
        0, K, body, jnp.full((OUT, tm), -1e30, dtype=jnp.float32))


def pointconv_pallas(feats_t, counts, params_t, tile_m=256):
    """feats_t: [K, D, M_pad] f32, counts: [1, M_pad] i32 -> [OUT, M_pad] f32."""
    K, D, M_pad = feats_t.shape
    w1t, b1, w2t, b2, w3t, b3 = params_t
    OUT = w3t.shape[0]
    assert M_pad % tile_m == 0 and tile_m % 128 == 0

    return pl.pallas_call(
        pointconv_kernel,
        out_shape=jax.ShapeDtypeStruct((OUT, M_pad), jnp.float32),
        grid=(M_pad // tile_m,),
        in_specs=[
            pl.BlockSpec((K, D, tile_m), lambda i: (0, 0, i)),   # feats tile
            pl.BlockSpec((1, tile_m), lambda i: (0, i)),         # neighbor counts
            pl.BlockSpec(w1t.shape, lambda i: (0, 0)),
            pl.BlockSpec(b1.shape, lambda i: (0, 0)),
            pl.BlockSpec(w2t.shape, lambda i: (0, 0)),
            pl.BlockSpec(b2.shape, lambda i: (0, 0)),
            pl.BlockSpec(w3t.shape, lambda i: (0, 0)),
            pl.BlockSpec(b3.shape, lambda i: (0, 0)),
        ],
        out_specs=pl.BlockSpec((OUT, tile_m), lambda i: (0, i)),
        compiler_params=pltpu.CompilerParams(
            dimension_semantics=("parallel",),
            vmem_limit_bytes=32 * 1024 * 1024,
        ),
    )(feats_t, counts, w1t, b1, w2t, b2, w3t, b3)


# ---------------------------------------------------------------------------
# SAModule.forward
# ---------------------------------------------------------------------------
def sa_module_forward(x, pos, batch, params, ratio, r, max_k=64, tile_m=256):
    pos_np = np.asarray(jax.device_get(pos))
    batch_np = np.asarray(jax.device_get(batch))

    idx_np = fps_numpy(pos_np, batch_np, ratio)                      # fps(...)
    nbr_idx, counts_np = radius_numpy(pos_np, pos_np[idx_np], r,     # radius(...)
                                      batch_np, batch_np[idx_np], max_k)

    # TODO(synk): fuse this gather into the kernel (scalar-prefetched nbr_idx +
    # manual DMA from pl.ANY x/pos refs) to avoid materializing the K-times
    # inflated feats tensor in HBM.
    idx = jnp.asarray(idx_np)
    idx_j = jnp.asarray(nbr_idx)                                     # [M, K]
    x_j = x[idx_j]                                                   # [M, K, C]
    pos_j = pos[idx_j]                                               # [M, K, 3]
    pos_i = pos[idx][:, None, :]                                     # [M, 1, 3]
    feats = jnp.concatenate([x_j, pos_j - pos_i], axis=-1).astype(jnp.float32)
    M, K, D = feats.shape

    # Lane-friendly layout: [K, D, M_pad]  (centers on lanes, padded to tile_m).
    tile_m = max(128, tile_m)
    M_pad = int(pl.cdiv(M, tile_m)) * tile_m
    feats_t = jnp.transpose(feats, (1, 2, 0))                        # [K, D, M]
    feats_t = jnp.pad(feats_t, ((0, 0), (0, 0), (0, M_pad - M)))
    counts = jnp.zeros((1, M_pad), jnp.int32).at[0, :M].set(
        jnp.asarray(counts_np, jnp.int32))

    # Transposed weights/biases so the kernel computes h = W^T @ f (+ b).
    w1, b1, w2, b2, w3, b3 = params
    params_t = (w1.T, b1.reshape(-1, 1), w2.T, b2.reshape(-1, 1),
                w3.T, b3.reshape(-1, 1))

    out_t = pointconv_pallas(feats_t, counts, params_t, tile_m=tile_m)  # [OUT, M_pad]
    x_out = out_t[:, :M].T                                              # [M, OUT]

    mask = (jnp.arange(K, dtype=jnp.int32)[None, :] <
            jnp.asarray(counts_np, jnp.int32)[:, None]).astype(jnp.float32)
    return (x_out, pos[idx], batch[idx]), (feats, mask)


def pointconv_ref(feats, mask, params):
    w1, b1, w2, b2, w3, b3 = params
    h = jnp.maximum(feats @ w1 + b1, 0.0)
    h = jnp.maximum(h @ w2 + b2, 0.0)
    h = h @ w3 + b3
    h = jnp.where(mask[:, :, None] > 0.0, h, -1e30)
    return jnp.max(h, axis=1)


if __name__ == "__main__":
    key = jax.random.PRNGKey(0)
    kx, kp, k1, k2, k3, k4, k5, k6 = jax.random.split(key, 8)

    # Small point cloud: 2 batches x 16 points, 4 features per point.
    N_PER, B, C = 16, 2, 4
    N = N_PER * B
    x = jax.random.normal(kx, (N, C), dtype=jnp.float32)
    pos = jax.random.uniform(kp, (N, 3), dtype=jnp.float32)
    batch = jnp.repeat(jnp.arange(B, dtype=jnp.int32), N_PER)

    # PointConv local_nn: MLP([C+3, 16, 16, 32]) (ReLU between layers, plain last).
    D_IN, H1, H2, OUT = C + 3, 16, 16, 32
    w1 = 0.1 * jax.random.normal(k1, (D_IN, H1), dtype=jnp.float32)
    b1 = 0.01 * jax.random.normal(k2, (1, H1), dtype=jnp.float32)
    w2 = 0.1 * jax.random.normal(k3, (H1, H2), dtype=jnp.float32)
    b2 = 0.01 * jax.random.normal(k4, (1, H2), dtype=jnp.float32)
    w3 = 0.1 * jax.random.normal(k5, (H2, OUT), dtype=jnp.float32)
    b3 = 0.01 * jax.random.normal(k6, (1, OUT), dtype=jnp.float32)
    params = (w1, b1, w2, b2, w3, b3)

    (x_out, pos_out, batch_out), (feats, mask) = sa_module_forward(
        x, pos, batch, params, ratio=0.5, r=0.6, max_k=64)
    jax.block_until_ready((x_out, pos_out, batch_out))

    ref = pointconv_ref(feats, mask, params)
    np.testing.assert_allclose(np.asarray(x_out), np.asarray(ref),
                               rtol=1e-4, atol=1e-4)
    assert x_out.shape == (16, OUT) and pos_out.shape == (16, 3)
    assert batch_out.shape == (16,)
    print("KERNEL_OK")
</pallas_src>

<mosaic_0001>
module attributes {stable_mosaic.version = 11 : i64} {
  func.func @pointconv_kernel(%arg0: i32, %arg1: memref<64x7x256xf32, #tpu.memory_space<vmem>>, %arg2: memref<1x256xi32, #tpu.memory_space<vmem>>, %arg3: memref<16x7xf32, #tpu.memory_space<vmem>>, %arg4: memref<16x1xf32, #tpu.memory_space<vmem>>, %arg5: memref<16x16xf32, #tpu.memory_space<vmem>>, %arg6: memref<16x1xf32, #tpu.memory_space<vmem>>, %arg7: memref<32x16xf32, #tpu.memory_space<vmem>>, %arg8: memref<32x1xf32, #tpu.memory_space<vmem>>, %arg9: memref<32x256xf32, #tpu.memory_space<vmem>>) attributes {dimension_semantics = [#tpu.dimension_semantics<parallel>], iteration_bounds = array<i64: 1>, scalar_prefetch = 0 : i64, scratch_operands = 0 : i64, tpu.core_type = #tpu.core_type<tc>, window_params = [{transform_indices = @transform_0, window_bounds = array<i64: 64, 7, 256>}, {transform_indices = @transform_1, window_bounds = array<i64: 1, 256>}, {pipeline_mode = #tpu.pipeline_mode<synchronous>, transform_indices = @transform_2, window_bounds = array<i64: 16, 7>}, {pipeline_mode = #tpu.pipeline_mode<synchronous>, transform_indices = @transform_3, window_bounds = array<i64: 16, 1>}, {pipeline_mode = #tpu.pipeline_mode<synchronous>, transform_indices = @transform_4, window_bounds = array<i64: 16, 16>}, {pipeline_mode = #tpu.pipeline_mode<synchronous>, transform_indices = @transform_5, window_bounds = array<i64: 16, 1>}, {pipeline_mode = #tpu.pipeline_mode<synchronous>, transform_indices = @transform_6, window_bounds = array<i64: 32, 16>}, {pipeline_mode = #tpu.pipeline_mode<synchronous>, transform_indices = @transform_7, window_bounds = array<i64: 32, 1>}, {transform_indices = @transform_8, window_bounds = array<i64: 32, 256>}]} {
    %c0 = arith.constant 0 : index
    %c0_0 = arith.constant 0 : index
    %0 = vector.load %arg3[%c0, %c0_0] : memref<16x7xf32, #tpu.memory_space<vmem>>, vector<16x7xf32>
    %c0_1 = arith.constant 0 : index
    %c0_2 = arith.constant 0 : index
    %1 = vector.load %arg4[%c0_1, %c0_2] : memref<16x1xf32, #tpu.memory_space<vmem>>, vector<16x1xf32>
    %c0_3 = arith.constant 0 : index
    %c0_4 = arith.constant 0 : index
    %2 = vector.load %arg5[%c0_3, %c0_4] : memref<16x16xf32, #tpu.memory_space<vmem>>, vector<16x16xf32>
    %c0_5 = arith.constant 0 : index
    %c0_6 = arith.constant 0 : index
    %3 = vector.load %arg6[%c0_5, %c0_6] : memref<16x1xf32, #tpu.memory_space<vmem>>, vector<16x1xf32>
    %c0_7 = arith.constant 0 : index
    %c0_8 = arith.constant 0 : index
    %4 = vector.load %arg7[%c0_7, %c0_8] : memref<32x16xf32, #tpu.memory_space<vmem>>, vector<32x16xf32>
    %c0_9 = arith.constant 0 : index
    %c0_10 = arith.constant 0 : index
    %5 = vector.load %arg8[%c0_9, %c0_10] : memref<32x1xf32, #tpu.memory_space<vmem>>, vector<32x1xf32>
    %c0_11 = arith.constant 0 : index
    %c0_12 = arith.constant 0 : index
    %6 = vector.load %arg2[%c0_11, %c0_12] : memref<1x256xi32, #tpu.memory_space<vmem>>, vector<1x256xi32>
    %cst = arith.constant -1.000000e+30 : f32
    %7 = vector.broadcast %cst : f32 to vector<32x256xf32>
    %c0_i32 = arith.constant 0 : i32
    %c64_i32 = arith.constant 64 : i32
    %8 = arith.addi %c0_i32, %c64_i32 : i32
    %c1_i32 = arith.constant 1 : i32
    %9 = scf.for %arg10 = %c0_i32 to %8 step %c1_i32 iter_args(%arg11 = %7) -> (vector<32x256xf32>)  : i32 {
      %11 = arith.index_cast %arg10 : i32 to index
      %c0_16 = arith.constant 0 : index
      %c0_17 = arith.constant 0 : index
      %12 = vector.load %arg1[%11, %c0_16, %c0_17] : memref<64x7x256xf32, #tpu.memory_space<vmem>>, vector<1x7x256xf32>
      %13 = vector.shape_cast %12 : vector<1x7x256xf32> to vector<7x256xf32>
      %cst_18 = arith.constant dense<0.000000e+00> : vector<16x256xf32>
      %14 = tpu.matmul %0, %13, %cst_18 {dimension_numbers = #tpu.dot_dimension_numbers<[1], [0], [0], [1], [0, 0, 1, 1], [], []>} : vector<16x7xf32>, vector<7x256xf32>, vector<16x256xf32> -> vector<16x256xf32>
      %15 = vector.broadcast %1 : vector<16x1xf32> to vector<16x256xf32>
      %16 = arith.addf %14, %15 : vector<16x256xf32>
      %cst_19 = arith.constant 0.000000e+00 : f32
      %17 = vector.broadcast %cst_19 : f32 to vector<16x256xf32>
      %18 = arith.maximumf %16, %17 : vector<16x256xf32>
      %cst_20 = arith.constant dense<0.000000e+00> : vector<16x256xf32>
      %19 = tpu.matmul %2, %18, %cst_20 {dimension_numbers = #tpu.dot_dimension_numbers<[1], [0], [0], [1], [0, 0, 1, 1], [], []>} : vector<16x16xf32>, vector<16x256xf32>, vector<16x256xf32> -> vector<16x256xf32>
      %20 = vector.broadcast %3 : vector<16x1xf32> to vector<16x256xf32>
      %21 = arith.addf %19, %20 : vector<16x256xf32>
      %cst_21 = arith.constant 0.000000e+00 : f32
      %22 = vector.broadcast %cst_21 : f32 to vector<16x256xf32>
      %23 = arith.maximumf %21, %22 : vector<16x256xf32>
      %cst_22 = arith.constant dense<0.000000e+00> : vector<32x256xf32>
      %24 = tpu.matmul %4, %23, %cst_22 {dimension_numbers = #tpu.dot_dimension_numbers<[1], [0], [0], [1], [0, 0, 1, 1], [], []>} : vector<32x16xf32>, vector<16x256xf32>, vector<32x256xf32> -> vector<32x256xf32>
      %25 = vector.broadcast %5 : vector<32x1xf32> to vector<32x256xf32>
      %26 = arith.addf %24, %25 : vector<32x256xf32>
      %27 = vector.broadcast %arg10 : i32 to vector<1x256xi32>
      %28 = arith.cmpi sgt, %6, %27 : vector<1x256xi32>
      %cst_23 = arith.constant -1.000000e+30 : f32
      %29 = vector.shape_cast %28 : vector<1x256xi1> to vector<1x256xi1>
      %30 = vector.broadcast %29 : vector<1x256xi1> to vector<32x256xi1>
      %31 = vector.broadcast %cst_23 : f32 to vector<32x256xf32>
      %32 = arith.select %30, %26, %31 : vector<32x256xi1>, vector<32x256xf32>
      %33 = arith.maximumf %arg11, %32 : vector<32x256xf32>
      scf.yield %33 : vector<32x256xf32>
    }
    %c64_i32_13 = arith.constant 64 : i32
    %c0_14 = arith.constant 0 : index
    %c0_15 = arith.constant 0 : index
    %10 = vector.load %arg9[%c0_14, %c0_15] : memref<32x256xf32, #tpu.memory_space<vmem>>, vector<32x256xf32>
    tpu.vector_store %arg9[%c0_14, %c0_15], %9 {strides = array<i32>} : memref<32x256xf32, #tpu.memory_space<vmem>>, vector<32x256xf32>,
    return
  }
  func.func @transform_0(%arg0: i32) -> (i32, i32, i32) {
    %c0_i32 = arith.constant 0 : i32
    %c0_i32_0 = arith.constant 0 : i32
    %c0_i32_1 = arith.constant 0 : i32
    return %c0_i32, %c0_i32_0, %arg0 : i32, i32, i32
  }
  func.func @transform_1(%arg0: i32) -> (i32, i32) {
    %c0_i32 = arith.constant 0 : i32
    %c0_i32_0 = arith.constant 0 : i32
    return %c0_i32, %arg0 : i32, i32
  }
  func.func @transform_2(%arg0: i32) -> (i32, i32) {
    %c0_i32 = arith.constant 0 : i32
    %c0_i32_0 = arith.constant 0 : i32
    %c0_i32_1 = arith.constant 0 : i32
    return %c0_i32, %c0_i32_0 : i32, i32
  }
  func.func @transform_3(%arg0: i32) -> (i32, i32) {
    %c0_i32 = arith.constant 0 : i32
    %c0_i32_0 = arith.constant 0 : i32
    %c0_i32_1 = arith.constant 0 : i32
    return %c0_i32, %c0_i32_0 : i32, i32
  }
  func.func @transform_4(%arg0: i32) -> (i32, i32) {
    %c0_i32 = arith.constant 0 : i32
    %c0_i32_0 = arith.constant 0 : i32
    %c0_i32_1 = arith.constant 0 : i32
    return %c0_i32, %c0_i32_0 : i32, i32
  }
  func.func @transform_5(%arg0: i32) -> (i32, i32) {
    %c0_i32 = arith.constant 0 : i32
    %c0_i32_0 = arith.constant 0 : i32
    %c0_i32_1 = arith.constant 0 : i32
    return %c0_i32, %c0_i32_0 : i32, i32
  }
  func.func @transform_6(%arg0: i32) -> (i32, i32) {
    %c0_i32 = arith.constant 0 : i32
    %c0_i32_0 = arith.constant 0 : i32
    %c0_i32_1 = arith.constant 0 : i32
    return %c0_i32, %c0_i32_0 : i32, i32
  }
  func.func @transform_7(%arg0: i32) -> (i32, i32) {
    %c0_i32 = arith.constant 0 : i32
    %c0_i32_0 = arith.constant 0 : i32
    %c0_i32_1 = arith.constant 0 : i32
    return %c0_i32, %c0_i32_0 : i32, i32
  }
  func.func @transform_8(%arg0: i32) -> (i32, i32) {
    %c0_i32 = arith.constant 0 : i32
    %c0_i32_0 = arith.constant 0 : i32
    return %c0_i32, %arg0 : i32, i32
  }
}

</mosaic_0001>

<bundles_post_ra>
// kernel: tpu_custom_call.1
= control target key start
LH: loop header
LB: loop body
LE: loop exit
PB: predicated region body
PF: predicated region fallthrough
CT: control target
= control target key end

     0   :  { %13 = vsyncpa [#allocation3], 0  ;;  %v805_v17 = vmov -1e+30   ;;  %v807_v18 = vmov -1e+30   ;;  %s937_s0 = inlined_call_operand.vmem [shape: f32[64,7,256], index: 0, kind: input, shape index: {}]   ;;  %s938_s1 = inlined_call_operand.vmem [shape: s32[1,256], index: 1, kind: input, shape index: {}]   ;;  %s939_s2 = inlined_call_operand.vmem [shape: f32[16,7], index: 2, kind: input, shape index: {}]   ;;  %s940_s3 = inlined_call_operand.vmem [shape: f32[16,1], index: 3, kind: input, shape index: {}]   ;;  %s941_s4 = inlined_call_operand.vmem [shape: f32[16,16], index: 4, kind: input, shape index: {}]   ;;  %s942_s5 = inlined_call_operand.vmem [shape: f32[16,1], index: 5, kind: input, shape index: {}]   ;;  %s943_s6 = inlined_call_operand.vmem [shape: f32[32,16], index: 6, kind: input, shape index: {}]   ;;  %s944_s7 = inlined_call_operand.vmem [shape: f32[32,1], index: 7, kind: input, shape index: {}]   ;;  %s945_s8 = inlined_call_operand.hbm [shape: f32[32,256], index: 8, kind: output, shape index: {}]  }
   0x1   :  { %v723_v0 = vld [vmem:[%s939_s2] sm:$0xff]  ;;  %v728_v1 = vld [vmem:[%s939_s2 + $0x8] sm:$0xff]  ;;  %v773_v10 = vld [vmem:[%s943_s6 + $0x10] sm:$0xff]  ;;  %v809_v19 = vmov -1e+30  }
   0x2   :  { %v733_v2 = vld [vmem:[%s940_s3] sm:$0xff]  ;;  %v738_v3 = vld [vmem:[%s940_s3 + $0x8] sm:$0xff]  ;;  %v778_v11 = vld [vmem:[%s943_s6 + $0x18] sm:$0xff]  ;;  %v811_v20 = vmov -1e+30  }
   0x3   :  { %v743_v4 = vld [vmem:[%s941_s4] sm:$0xff]  ;;  %v748_v5 = vld [vmem:[%s941_s4 + $0x8] sm:$0xff]  ;;  %v793_v14 = vld [vmem:[%s944_s7 + $0x10] sm:$0xff]  ;;  %v813_v21 = vmov -1e+30  }
   0x4   :  { %v753_v6 = vld [vmem:[%s942_s5] sm:$0xff]  ;;  %v758_v7 = vld [vmem:[%s942_s5 + $0x8] sm:$0xff]  ;;  %v798_v15 = vld [vmem:[%s944_s7 + $0x18] sm:$0xff]  ;;  %v815_v22 = vmov -1e+30  }
   0x5   :  { %v763_v8 = vld [vmem:[%s943_s6] sm:$0xff]  ;;  %v768_v9 = vld [vmem:[%s943_s6 + $0x8] sm:$0xff]  ;;  %v817_v23 = vmov -1e+30   ;;  %v819_v24 = vmov -1e+30  }
   0x6   :  { %v783_v12 = vld [vmem:[%s944_s7] sm:$0xff]  ;;  %v788_v13 = vld [vmem:[%s944_s7 + $0x8] sm:$0xff]  ;;  %s821_s7 = smov 0  }
   0x7   :  { %v803_v16 = vld [vmem:[%s938_s1] sm:$0x3] }
   0x8 LB: > { %v670_v25 = vmov 0.0   ;;  %v671_v26 = vmov 0   ;;  %s486_s1 = sshll.u32 %s668_s7, 4  ;;  %vm83_vm0 = vcmask 1046528   ;;  %v390_v27 = vstv %s668_s7  ;;  %s52_s7 = sadd.s32 1, %s668_s7   ;;  %s668_s7 = sphi %s821_s7, %s52_s7   ;;  %v664_v24 = vphi %v819_v24, %v953_v24   ;;  %v660_v23 = vphi %v817_v23, %v952_v23   ;;  %v656_v22 = vphi %v815_v22, %v951_v22   ;;  %v652_v21 = vphi %v813_v21, %v950_v21   ;;  %v648_v20 = vphi %v811_v20, %v949_v20   ;;  %v644_v19 = vphi %v809_v19, %v948_v19   ;;  %v640_v18 = vphi %v807_v18, %v947_v18   ;;  %v636_v17 = vphi %v805_v17, %v946_v17  }
   0x9   : > { %154 = vmatprep.mubr.f32.mxu1 %v670_v25  ;;  %572 = vset.pattern.permute.xlu0 %v671_v26  ;;  %s63_s14 = scalar_lea.vmem %s937_s0, %s486_s1  ;;  %vm391_vm1 = vcmp.gt.s32.totalorder %v803_v16, %v390_v27  ;;  %vm76_vm2 = vcmask 56320   ;;  %vm181_vm3 = vcmask 130048   ;;  %v393_v63 = vlaneseq  ;;  %p49_p0 = scmp.ge.s32.totalorder %s52_s7, 64  }
   0xa   : > { %68 = vperm.xlu0 %572, %v733_v2   ;;  %573 = vset.pattern.permute.xlu1 %v671_v26  ;;  %v65_v28 = vld [vmem:[%s63_s14 + $0x8] sm:$0x7f]  ;;  %v64_v29 = vld [vmem:[%s63_s14] sm:$0x7f]  ;;  %v860_v30 = vsel %vm391_vm1, 1, %v671_v26  ;;  %s672_s15 = smov (%p49_p0), [#allocation2]  }
   0xb   : > { %173 = vperm.xlu1 %573, %v753_v6   ;;  %365 = vmatprep.mubr.f32.mxu0 %v670_v25  ;;  %v394_v26 = vshrl.u32 %v393_v63, 7  ;;  %s432_s16 = sshll.u32 (%p49_p0), %s672_s15, 4  ;;  %s433_s16 = int_to_ptr.vmem [resolvable:$true] %s432_s16 }
   0xc   : > { %476 = vmatprep.subr.msk.mxu1 %vm83_vm0, %v65_v28  ;;  %s574_s2 = scalar_lea.vmem (%p49_p0), %s433_s16, 1024  ;;  %p579_p2 = scmp.lt.s32.totalorder (%p49_p0), %s433_s16, %s433_s16 }
   0xd   : > { %477 = vmatpush1.msk.msra.mxu1 %vm83_vm0, %v64_v29  ;;  %v395_v27 = vsub.s32 0, %v394_v26  ;;  %v399_v28 = vsub.s32 1, %v394_v26  ;;  %p575_p1 = scmp.ne.s32.totalorder (%p49_p0), %s433_s16, %s574_s2  ;;  %p580_p3 = scmp.lt.s32.totalorder (%p49_p0), %s574_s2, %s574_s2 }
   0xe   : > { %73 = vperm.xlu0 %572, %v738_v3   ;;  %478 = vmatmul.mubr.msk.f32.vlgmr.msra.gmra.mrb[0].mxu1 %vm76_vm2, %v723_v0 }
   0xf   : > { %178 = vperm.xlu1 %573, %v758_v7   ;;  %160 = vmatprep.mubr.f32.mxu1 %v670_v25  ;;  %v396_v29 = vrot.slane %v860_v30, %v395_v27  ;;  %p581_p4 = por (%p49_p0), %p580_p3, %p579_p2 }
  0x11   : > { %vm401_vm4 = vcmp.eq.s32.totalorder %v396_v29, 1  ;;  %p582_p5 = pnand (%p49_p0), %p581_p4, %p575_p1 }
  0x12   : > { %271 = vperm.xlu0 %572, %v783_v12   ;;  %479 = vmatmul.mubr.msk.f32.gmra.mrb[2].mxu1 %vm76_vm2, %v728_v1 }
  0x13   : > { %276 = vperm.xlu1 %573, %v788_v13   ;;  %252 = vmatprep.mubr.f32.mxu1 %v670_v25 }
  0x16   : > { %281 = vperm.xlu0 %572, %v793_v14  }
  0x17   : > { %286 = vperm.xlu1 %573, %v798_v15  }
  0x89   : > { %v69_v31 = vpop.permute.xlu0 %68 }
  0x8a   : > { %v174_v47 = vpop.permute.xlu1 %173 }
  0x8d   : > { %v74_v35 = vpop.permute.xlu0 %73 }
  0x8e   : > { %v179_v51 = vpop.permute.xlu1 %178 }
  0xe1   : > { %v156_v32 = vpop.f32.mrb[0].mxu1 }
  0xe2   : > { %v158_v33 = vpop.f32.mrb[1].mxu1  ;;  %v157_v34 = vadd.f32 %v156_v32, %v69_v31  ;;  %v272_v32 = vpop.permute.xlu0 %271 }
  0xe3   : > { %v159_v36 = vadd.f32 %v158_v33, %v69_v31  ;;  %v400_v31 = vrot.slane %v860_v30, %v399_v28 }
  0xe4   : > { %v167_v41 = vmax.f32 %v157_v34, 0.0 }
  0xe5   : > { %v162_v37 = vpop.f32.mrb[2].mxu1  ;;  %v168_v43 = vmax.f32 %v159_v36, 0.0  ;;  %vm402_vm5 = vcmp.eq.s32.totalorder %v400_v31, 1 }
  0xe6   : > { %v163_v38 = vadd.f32 %v162_v37, %v74_v35  ;;  %v164_v39 = vpop.f32.mrb[3].mxu1  ;;  %v277_v37 = vpop.permute.xlu1 %276 }
  0xe7   : > { %v165_v40 = vadd.f32 %v164_v39, %v74_v35 }
  0xe8   : > { %v169_v42 = vmax.f32 %v163_v38, 0.0 }
  0xe9   : > { %v170_v44 = vmax.f32 %v165_v40, 0.0 }
  0xea   : > { %v489_v45 = vpack.c.bf16 %v169_v42, %v167_v41 }
  0xeb   : > { %v487_v46 = vpack.c.bf16 %v170_v44, %v168_v43 }
  0xed   : > { %488 = vmatprep.subr.bf16.mxu1 %v487_v46 }
  0xee   : > { %490 = vmatpush1.bf16.msra.mxu1 %v489_v45  ;;  %v282_v45 = vpop.permute.xlu0 %281 }
  0xf1   : > { %480 = vmatmul.mubr.msk.f32.vlgmr.msra.gmra.mrb[4].mxu1 %vm181_vm3, %v743_v4 }
  0xf2   : > { %258 = vmatprep.mubr.f32.mxu1 %v670_v25 }
  0xf5   : > { %481 = vmatmul.mubr.msk.f32.gmra.mrb[6].mxu1 %vm181_vm3, %v748_v5 }
 0x1c4   : > { %v254_v48 = vpop.f32.mrb[4].mxu1 }
 0x1c5   : > { %v256_v49 = vpop.f32.mrb[5].mxu1  ;;  %v255_v50 = vadd.f32 %v254_v48, %v174_v47 }
 0x1c6   : > { %v257_v52 = vadd.f32 %v256_v49, %v174_v47 }
 0x1c7   : > { %v265_v57 = vmax.f32 %v255_v50, 0.0 }
 0x1c8   : > { %v260_v53 = vpop.f32.mrb[6].mxu1  ;;  %v266_v59 = vmax.f32 %v257_v52, 0.0 }
 0x1c9   : > { %v261_v54 = vadd.f32 %v260_v53, %v179_v51  ;;  %v262_v55 = vpop.f32.mrb[7].mxu1  ;;  %v287_v53 = vpop.permute.xlu1 %286 }
 0x1ca   : > { %v263_v56 = vadd.f32 %v262_v55, %v179_v51 }
 0x1cb   : > { %v267_v58 = vmax.f32 %v261_v54, 0.0 }
 0x1cc   : > { %v268_v60 = vmax.f32 %v263_v56, 0.0 }
 0x1cd   : > { %v493_v61 = vpack.c.bf16 %v267_v58, %v265_v57 }
 0x1ce   : > { %v491_v62 = vpack.c.bf16 %v268_v60, %v266_v59 }
 0x1d0   : > { %492 = vmatprep.subr.bf16.mxu0 %v491_v62 }
 0x1d1   : > { %494 = vmatpush1.bf16.msra.mxu0 %v493_v61 }
 0x1d4   : > { %482 = vmatmul.mubr.msk.f32.vlgmr.msra.gmra.mrb[0].mxu0 %vm181_vm3, %v763_v8 }
 0x1d5   : > { %371 = vmatprep.mubr.f32.mxu0 %v670_v25 }
 0x1d8   : > { %483 = vmatmul.mubr.msk.f32.gmra.mrb[2].mxu0 %vm181_vm3, %v768_v9 }
 0x1d9   : > { %377 = vmatprep.mubr.f32.mxu0 %v670_v25 }
 0x1dc   : > { %484 = vmatmul.mubr.msk.f32.gmra.mrb[4].mxu0 %vm181_vm3, %v773_v10 }
 0x1dd   : > { %383 = vmatprep.mubr.f32.mxu0 %v670_v25 }
 0x1e0   : > { %485 = vmatmul.mubr.msk.f32.gmra.mrb[6].mxu0 %vm181_vm3, %v778_v11 }
 0x2a7   : > { %v367_v33 = vpop.f32.mrb[0].mxu0 }
 0x2a8   : > { %v368_v34 = vadd.f32 %v367_v33, %v272_v32  ;;  %v369_v35 = vpop.f32.mrb[1].mxu0 }
 0x2a9   : > { %v370_v36 = vadd.f32 %v369_v35, %v272_v32 }
 0x2aa   : > { %v403_v25 = vsel %vm401_vm4, %v368_v34, -1e+30 }
 0x2ab   : > { %v411_v38 = vmax.f32 %v664_v24, %v403_v25   ;;  %v404_v39 = vsel %vm402_vm5, %v370_v36, -1e+30  ;;  %v373_v40 = vpop.f32.mrb[2].mxu0 }
 0x2ac   : > { %v412_v41 = vmax.f32 %v660_v23, %v404_v39   ;;  %v374_v42 = vadd.f32 %v373_v40, %v277_v37  ;;  %v375_v43 = vpop.f32.mrb[3].mxu0 }
 0x2ad   : > { %v376_v30 = vadd.f32 %v375_v43, %v277_v37  ;;  %419 = vst [vmem:[#allocation2] sm:$0xff] (%p49_p0), %v411_v38 }
 0x2ae   : > { %v405_v44 = vsel %vm401_vm4, %v374_v42, -1e+30  ;;  %420 = vst [vmem:[#allocation2 + $0x8] sm:$0xff] (%p49_p0), %v412_v41 }
 0x2af   : > { %v413_v46 = vmax.f32 %v656_v22, %v405_v44   ;;  %v406_v47 = vsel %vm402_vm5, %v376_v30, -1e+30  ;;  %v379_v48 = vpop.f32.mrb[4].mxu0 }
 0x2b0   : > { %v414_v49 = vmax.f32 %v652_v21, %v406_v47   ;;  %v380_v50 = vadd.f32 %v379_v48, %v282_v45  ;;  %v381_v24 = vpop.f32.mrb[5].mxu0 }
 0x2b1   : > { %v382_v51 = vadd.f32 %v381_v24, %v282_v45  ;;  %v953_v24 = vmov %v411_v38  ;;  %421 = vst [vmem:[#allocation2 + $0x10] sm:$0xff] (%p49_p0), %v413_v46 }
 0x2b2   : > { %v407_v52 = vsel %vm401_vm4, %v380_v50, -1e+30  ;;  %422 = vst [vmem:[#allocation2 + $0x18] sm:$0xff] (%p49_p0), %v414_v49 }
 0x2b3   : > { %v415_v54 = vmax.f32 %v648_v20, %v407_v52   ;;  %v408_v23 = vsel %vm402_vm5, %v382_v51, -1e+30  ;;  %v385_v55 = vpop.f32.mrb[6].mxu0 }
 0x2b4   : > { %v416_v56 = vmax.f32 %v644_v19, %v408_v23   ;;  %v386_v57 = vadd.f32 %v385_v55, %v287_v53  ;;  %v387_v22 = vpop.f32.mrb[7].mxu0  ;;  %v952_v23 = vmov %v412_v41  ;;  %51 = sbr.rel (!%p49_p0) target bundleno = 8 (0x8), region = 60 }
 0x2b5   : > { %v388_v58 = vadd.f32 %v387_v22, %v287_v53  ;;  %v949_v20 = vmov %v415_v54  ;;  %v951_v22 = vmov %v413_v46  ;;  %423 = vst [vmem:[#allocation2 + $0x20] sm:$0xff] (%p49_p0), %v415_v54 }
 0x2b6   : > { %v409_v59 = vsel %vm401_vm4, %v386_v57, -1e+30  ;;  %v948_v19 = vmov %v416_v56  ;;  %424 = vst [vmem:[#allocation2 + $0x28] sm:$0xff] (%p49_p0), %v416_v56 }
 0x2b7   : > { %v417_v60 = vmax.f32 %v640_v18, %v409_v59   ;;  %v410_v21 = vsel %vm402_vm5, %v388_v58, -1e+30 }
 0x2b8   : > { %v418_v61 = vmax.f32 %v636_v17, %v410_v21   ;;  %v950_v21 = vmov %v414_v49 }
 0x2b9   : > { %v947_v18 = vmov %v417_v60  ;;  %425 = vst [vmem:[#allocation2 + $0x30] sm:$0xff] (%p49_p0), %v417_v60 }
 0x2ba   : > { %v946_v17 = vmov %v418_v61  ;;  %426 = vst [vmem:[#allocation2 + $0x38] sm:$0xff] (%p49_p0), %v418_v61 }
 0x2bb   :  { %585 = shalt.err (!%p582_p5)
}
 0x2bc   :  { %s586_s0 = scalar_lea.hbm %s945_s8, 1024 }
 0x2bd   :  { %p587_p6 = scmp.ne.s32.totalorder %s945_s8, %s586_s0  ;;  %p590_p7 = scmp.lt.u32.totalorder %s586_s0, %s945_s8 }
 0x2bf   :  { %p592_p8 = pnand %p590_p7, %p587_p6 }
 0x2c1   :  { %595 = shalt.err (!%p592_p8)
}
 0x2c2   :  { %s673_s22 = smov 256   ;;  %s674_s4 = smov 16  }
 0x2c3   :  { %438 = dma.vmem_to_hbm [thread:$0]  %s433_s16, 1024, %s945_s8, [#allocation3], %s673_s22, %s673_s22, %s674_s4  }
 0x2c4   :  { %632 = dma.done.wait [#allocation3], 1024  }
 0x2c5   :  { %633 = vsyncadd [#allocation3], 4294966272 }
 0x2c6   :  { %442 = vsyncpa [#allocation3], 1 }

</bundles_post_ra>
